<compile_context>
chip_gen: v7x
topology: tpu7x:2x2x1
jax: 0.10.0
libtpu: 0.0.40
codegen_flags: <defaults>
</compile_context>

<pallas_src>
import functools

import jax
import jax.numpy as jnp
from jax.experimental import pallas as pl
from jax.experimental.pallas import tpu as pltpu

# Model dims (MNIST MLP: 784 -> 512 -> 10)
D_IN = 784
D_HID = 512
D_OUT = 10

# fc2 output padded to one full lane group for unmasked (vst) stores.
N_PAD = 128

# ScaleLayer(bit=8, scale=2**-3): symmetric fixed-point fake quantization.
SC_BIT = 8
SC_SCALE = 2.0 ** (-3)
SC_INV_SCALE = 1.0 / SC_SCALE
SC_QMAX = float(2 ** (SC_BIT - 1) - 1)   # 127
SC_QMIN = float(-(2 ** (SC_BIT - 1)))    # -128

_NEG_MASK = -1e9  # bias for padded logits -> exp() == 0 in f32


def net_kernel(x_ref, w1_ref, b1_ref, w2_ref, b2_ref, o_ref):
    # x_ref:  (TB, 784)  f32   (cast to bf16 in-kernel, no wrapper pass)
    # w1_ref: (784, 512) bf16      b1_ref: (1, 512) f32
    # w2_ref: (512, 128) bf16, pre-scaled by 2^-3 (sc1 folded in), pad cols = 0
    # b2_ref: (1, 128)  f32, padded lanes = -1e9
    # o_ref:  (TB, 128) bf16   (wrapper slices [:, :10])

    # fc1 + bias + ReLU (bf16 MXU feed, f32 accumulation)
    x = x_ref[...].astype(jnp.bfloat16)
    h = jnp.dot(x, w1_ref[...], preferred_element_type=jnp.float32)
    h = jnp.maximum(h + b1_ref[...], 0.0)

    # sc1: ScaleLayer(bit=8, scale=2**-3) -> clamp(round(x/scale), qmin, qmax)*scale
    # The *scale factor is folded into w2 (power of two => exact), so only the
    # integer quantized values flow into fc2; they fit bf16 exactly (<= 7 bits).
    # TODO(synk): exact ScaleLayer source not in the spec; standard fixed-point
    # fake-quant (round-half-even, clamp to [-128, 127]) is assumed here.
    q = jnp.clip(jnp.round(h * SC_INV_SCALE), SC_QMIN, SC_QMAX)

    # Dropout(p=0.5): eval-mode identity.
    # TODO(synk): training-mode dropout would use pltpu.prng_seed/prng_random_bits.

    # fc2 (w2 already carries the 2^-3 scale)
    z = jnp.dot(q.astype(jnp.bfloat16), w2_ref[...],
                preferred_element_type=jnp.float32) + b2_ref[...]

    # log_softmax over the class dim, all in f32; padded lanes carry -1e9.
    m = jnp.max(z, axis=-1, keepdims=True)
    s = z - m
    lse = jnp.log(jnp.sum(jnp.exp(s), axis=-1, keepdims=True))
    o_ref[...] = (s - lse).astype(o_ref.dtype)


def _round_up(n, m):
    return (n + m - 1) // m * m


def prepare_params(w1, b1, w2, b2):
    """Cast/pad params once. w2 gets sc1's scale folded in (exact, power of 2)."""
    w1p = w1.astype(jnp.bfloat16)                                     # (784, 512)
    w2s = (w2.astype(jnp.float32) * SC_SCALE).astype(jnp.bfloat16)    # fold sc1
    w2p = jnp.zeros((D_HID, N_PAD), jnp.bfloat16).at[:, :D_OUT].set(w2s)
    b1p = b1.reshape(1, D_HID).astype(jnp.float32)
    b2p = jnp.full((1, N_PAD), _NEG_MASK, jnp.float32).at[0, :D_OUT].set(
        b2.reshape(-1).astype(jnp.float32))
    return w1p, b1p, w2p, b2p


@functools.partial(jax.jit, static_argnames=("tb",))
def net_forward(x_nchw, w1p, b1p, w2p, b2p, *, tb=1024):
    B = x_nchw.shape[0]
    # torch.flatten(x, 1): pure reshape, no extra HBM pass (no cast/pad here).
    x2d = x_nchw.reshape(B, D_IN)

    # Batch tile: big enough to amortize ~0.35us/step, but capped at ceil(B/2)
    # so the grid has >= 2 steps and both v7x TensorCores get work.
    half = -(-B // 2)
    TB = min(tb, _round_up(half, 8))
    Bp = _round_up(B, TB)
    if Bp != B:
        x2d = jnp.pad(x2d, ((0, Bp - B), (0, 0)))
    grid = (Bp // TB,)

    flops = 2 * Bp * (D_IN * D_HID + D_HID * N_PAD)
    bytes_accessed = (x2d.size * 4 + w1p.size * 2 + w2p.size * 2
                      + b1p.size * 4 + b2p.size * 4 + Bp * N_PAD * 2)

    out = pl.pallas_call(
        net_kernel,
        out_shape=jax.ShapeDtypeStruct((Bp, N_PAD), jnp.bfloat16),
        grid=grid,
        in_specs=[
            pl.BlockSpec((TB, D_IN), lambda i: (i, 0)),      # x: tiled over batch
            pl.BlockSpec((D_IN, D_HID), lambda i: (0, 0)),   # w1: VMEM-resident
            pl.BlockSpec((1, D_HID), lambda i: (0, 0)),      # b1: VMEM-resident
            pl.BlockSpec((D_HID, N_PAD), lambda i: (0, 0)),  # w2: VMEM-resident
            pl.BlockSpec((1, N_PAD), lambda i: (0, 0)),      # b2: VMEM-resident
        ],
        out_specs=pl.BlockSpec((TB, N_PAD), lambda i: (i, 0)),
        compiler_params=pltpu.CompilerParams(
            dimension_semantics=("parallel",),               # megacore on v7x
            vmem_limit_bytes=48 * 1024 * 1024,               # v5e default (16MiB) too low
        ),
        cost_estimate=pl.CostEstimate(
            flops=flops,
            transcendentals=Bp * (N_PAD + 1),
            bytes_accessed=bytes_accessed,
        ),
    )(x2d, w1p, b1p, w2p, b2p)

    return out[:B, :D_OUT]


def init_params(key):
    # PyTorch Linear-style uniform init; weights stored transposed (in, out).
    k1, k2, k3, k4 = jax.random.split(key, 4)
    bound1 = 1.0 / (D_IN ** 0.5)
    bound2 = 1.0 / (D_HID ** 0.5)
    w1 = jax.random.uniform(k1, (D_IN, D_HID), jnp.float32, -bound1, bound1)
    b1 = jax.random.uniform(k2, (D_HID,), jnp.float32, -bound1, bound1)
    w2 = jax.random.uniform(k3, (D_HID, D_OUT), jnp.float32, -bound2, bound2)
    b2 = jax.random.uniform(k4, (D_OUT,), jnp.float32, -bound2, bound2)
    return w1, b1, w2, b2


if __name__ == "__main__":
    key = jax.random.PRNGKey(0)
    kx, kp = jax.random.split(key)

    B = 2
    x = jax.random.normal(kx, (B, 1, 28, 28), jnp.float32)   # MNIST-like NCHW
    w1, b1, w2, b2 = init_params(kp)
    params = prepare_params(w1, b1, w2, b2)

    out = net_forward(x, *params)
    out = jax.block_until_ready(out)

    # sanity: log_softmax rows should sum (in prob space) to ~1 and be finite
    assert out.shape == (B, D_OUT)
    out_f32 = out.astype(jnp.float32)
    row_sums = jnp.sum(jnp.exp(out_f32), axis=1)
    assert bool(jnp.all(jnp.abs(row_sums - 1.0) < 2e-2))   # bf16 log-prob output
    assert bool(jnp.all(jnp.isfinite(out_f32)))

    print("KERNEL_OK")
</pallas_src>

<mosaic_0001>
module attributes {stable_mosaic.version = 11 : i64} {
  func.func @net_kernel(%arg0: i32, %arg1: memref<8x784xf32, #tpu.memory_space<vmem>>, %arg2: memref<784x512xbf16, #tpu.memory_space<vmem>>, %arg3: memref<1x512xf32, #tpu.memory_space<vmem>>, %arg4: memref<512x128xbf16, #tpu.memory_space<vmem>>, %arg5: memref<1x128xf32, #tpu.memory_space<vmem>>, %arg6: memref<8x128xbf16, #tpu.memory_space<vmem>>) attributes {dimension_semantics = [#tpu.dimension_semantics<parallel>], iteration_bounds = array<i64: 1>, scalar_prefetch = 0 : i64, scratch_operands = 0 : i64, tpu.core_type = #tpu.core_type<tc>, window_params = [{transform_indices = @transform_0, window_bounds = array<i64: 8, 784>}, {pipeline_mode = #tpu.pipeline_mode<synchronous>, transform_indices = @transform_1, window_bounds = array<i64: 784, 512>}, {pipeline_mode = #tpu.pipeline_mode<synchronous>, transform_indices = @transform_2, window_bounds = array<i64: 1, 512>}, {pipeline_mode = #tpu.pipeline_mode<synchronous>, transform_indices = @transform_3, window_bounds = array<i64: 512, 128>}, {pipeline_mode = #tpu.pipeline_mode<synchronous>, transform_indices = @transform_4, window_bounds = array<i64: 1, 128>}, {transform_indices = @transform_5, window_bounds = array<i64: 8, 128>}]} {
    %c0 = arith.constant 0 : index
    %c0_0 = arith.constant 0 : index
    %0 = vector.load %arg1[%c0, %c0_0] : memref<8x784xf32, #tpu.memory_space<vmem>>, vector<8x784xf32>
    %1 = arith.truncf %0 : vector<8x784xf32> to vector<8x784xbf16>
    %c0_1 = arith.constant 0 : index
    %c0_2 = arith.constant 0 : index
    %2 = vector.load %arg2[%c0_1, %c0_2] : memref<784x512xbf16, #tpu.memory_space<vmem>>, vector<784x512xbf16>
    %cst = arith.constant dense<0.000000e+00> : vector<8x512xf32>
    %3 = tpu.matmul %1, %2, %cst {dimension_numbers = #tpu.dot_dimension_numbers<[1], [0], [0], [1], [0, 0, 1, 1], [], []>} : vector<8x784xbf16>, vector<784x512xbf16>, vector<8x512xf32> -> vector<8x512xf32>
    %c0_3 = arith.constant 0 : index
    %c0_4 = arith.constant 0 : index
    %4 = vector.load %arg3[%c0_3, %c0_4] : memref<1x512xf32, #tpu.memory_space<vmem>>, vector<1x512xf32>
    %5 = vector.broadcast %4 : vector<1x512xf32> to vector<8x512xf32>
    %6 = arith.addf %3, %5 : vector<8x512xf32>
    %cst_5 = arith.constant 0.000000e+00 : f32
    %7 = vector.broadcast %cst_5 : f32 to vector<8x512xf32>
    %8 = arith.maximumf %6, %7 : vector<8x512xf32>
    %cst_6 = arith.constant 8.000000e+00 : f32
    %9 = vector.broadcast %cst_6 : f32 to vector<8x512xf32>
    %10 = arith.mulf %8, %9 : vector<8x512xf32>
    %11 = math.roundeven %10 : vector<8x512xf32>
    %cst_7 = arith.constant -1.280000e+02 : f32
    %cst_8 = arith.constant 1.270000e+02 : f32
    %12 = vector.broadcast %cst_7 : f32 to vector<8x512xf32>
    %13 = arith.maximumf %12, %11 : vector<8x512xf32>
    %14 = vector.broadcast %cst_8 : f32 to vector<8x512xf32>
    %15 = arith.minimumf %14, %13 : vector<8x512xf32>
    %16 = arith.truncf %15 : vector<8x512xf32> to vector<8x512xbf16>
    %c0_9 = arith.constant 0 : index
    %c0_10 = arith.constant 0 : index
    %17 = vector.load %arg4[%c0_9, %c0_10] : memref<512x128xbf16, #tpu.memory_space<vmem>>, vector<512x128xbf16>
    %cst_11 = arith.constant dense<0.000000e+00> : vector<8x128xf32>
    %18 = tpu.matmul %16, %17, %cst_11 {dimension_numbers = #tpu.dot_dimension_numbers<[1], [0], [0], [1], [0, 0, 1, 1], [], []>} : vector<8x512xbf16>, vector<512x128xbf16>, vector<8x128xf32> -> vector<8x128xf32>
    %c0_12 = arith.constant 0 : index
    %c0_13 = arith.constant 0 : index
    %19 = vector.load %arg5[%c0_12, %c0_13] : memref<1x128xf32, #tpu.memory_space<vmem>>, vector<1x128xf32>
    %20 = vector.broadcast %19 : vector<1x128xf32> to vector<8x128xf32>
    %21 = arith.addf %18, %20 : vector<8x128xf32>
    %cst_14 = arith.constant dense<0xFF800000> : vector<8xf32>
    %22 = vector.multi_reduction <maximumf>, %21, %cst_14 [1] : vector<8x128xf32> to vector<8xf32>
    %23 = vector.shape_cast %22 : vector<8xf32> to vector<8x1xf32>
    %24 = vector.broadcast %23 : vector<8x1xf32> to vector<8x128xf32>
    %25 = arith.subf %21, %24 : vector<8x128xf32>
    %26 = math.exp %25 : vector<8x128xf32>
    %cst_15 = arith.constant dense<0.000000e+00> : vector<8xf32>
    %27 = vector.multi_reduction <add>, %26, %cst_15 [1] : vector<8x128xf32> to vector<8xf32>
    %28 = vector.shape_cast %27 : vector<8xf32> to vector<8x1xf32>
    %29 = math.log %28 : vector<8x1xf32>
    %30 = vector.broadcast %29 : vector<8x1xf32> to vector<8x128xf32>
    %31 = arith.subf %25, %30 : vector<8x128xf32>
    %32 = arith.truncf %31 : vector<8x128xf32> to vector<8x128xbf16>
    %c0_16 = arith.constant 0 : index
    %c0_17 = arith.constant 0 : index
    %33 = vector.load %arg6[%c0_16, %c0_17] : memref<8x128xbf16, #tpu.memory_space<vmem>>, vector<8x128xbf16>
    tpu.vector_store %arg6[%c0_16, %c0_17], %32 {strides = array<i32>} : memref<8x128xbf16, #tpu.memory_space<vmem>>, vector<8x128xbf16>,
    return
  }
  func.func @transform_0(%arg0: i32) -> (i32, i32) {
    %c0_i32 = arith.constant 0 : i32
    %c0_i32_0 = arith.constant 0 : i32
    return %arg0, %c0_i32 : i32, i32
  }
  func.func @transform_1(%arg0: i32) -> (i32, i32) {
    %c0_i32 = arith.constant 0 : i32
    %c0_i32_0 = arith.constant 0 : i32
    %c0_i32_1 = arith.constant 0 : i32
    return %c0_i32, %c0_i32_0 : i32, i32
  }
  func.func @transform_2(%arg0: i32) -> (i32, i32) {
    %c0_i32 = arith.constant 0 : i32
    %c0_i32_0 = arith.constant 0 : i32
    %c0_i32_1 = arith.constant 0 : i32
    return %c0_i32, %c0_i32_0 : i32, i32
  }
  func.func @transform_3(%arg0: i32) -> (i32, i32) {
    %c0_i32 = arith.constant 0 : i32
    %c0_i32_0 = arith.constant 0 : i32
    %c0_i32_1 = arith.constant 0 : i32
    return %c0_i32, %c0_i32_0 : i32, i32
  }
  func.func @transform_4(%arg0: i32) -> (i32, i32) {
    %c0_i32 = arith.constant 0 : i32
    %c0_i32_0 = arith.constant 0 : i32
    %c0_i32_1 = arith.constant 0 : i32
    return %c0_i32, %c0_i32_0 : i32, i32
  }
  func.func @transform_5(%arg0: i32) -> (i32, i32) {
    %c0_i32 = arith.constant 0 : i32
    %c0_i32_0 = arith.constant 0 : i32
    return %arg0, %c0_i32 : i32, i32
  }
}

</mosaic_0001>

<bundles_post_ra>
// kernel: net_forward.1
= control target key start
LH: loop header
LB: loop body
LE: loop exit
PB: predicated region body
PF: predicated region fallthrough
CT: control target
= control target key end

     0   :  { %10 = vsyncpa [#allocation3], 0  ;;  %s2628_s18 = smov [#allocation2]   ;;  %s2800_s0 = inlined_call_operand.vmem [shape: f32[8,784], index: 0, kind: input, shape index: {}]   ;;  %s2801_s1 = inlined_call_operand.hbm [shape: bf16[784,512], index: 1, kind: input, shape index: {}]   ;;  %s2802_s2 = inlined_call_operand.vmem [shape: f32[1,512], index: 2, kind: input, shape index: {}]   ;;  %s2803_s3 = inlined_call_operand.vmem [shape: bf16[512,128], index: 3, kind: input, shape index: {}]   ;;  %s2804_s4 = inlined_call_operand.vmem [shape: f32[1,128], index: 4, kind: input, shape index: {}]   ;;  %s2805_s5 = inlined_call_operand.vmem [shape: bf16[8,128], index: 5, kind: output, shape index: {}]  }
   0x1   :  { %s18_s19 = sshll.u32 %s2628_s18, 4  ;;  %s2604_s22 = scalar_lea.hbm %s2801_s1, 25088  ;;  %s19_s19 = int_to_ptr.vmem [resolvable:$true] %s18_s19 }
   0x2   :  { %p2605_p0 = scmp.ne.s32.totalorder %s2801_s1, %s2604_s22  ;;  %p2608_p1 = scmp.lt.u32.totalorder %s2604_s22, %s2801_s1 }
   0x4   :  { %p2610_p2 = pnand %p2608_p1, %p2605_p0 }
   0x6   :  { %2613 = shalt.err (!%p2610_p2)
}
   0x7   :  { %s2614_s27 = scalar_lea.vmem %s19_s19, 25088  ;;  %p2619_p4 = scmp.lt.s32.totalorder %s19_s19, %s19_s19 }
   0x8   :  { %p2615_p3 = scmp.ne.s32.totalorder %s19_s19, %s2614_s27  ;;  %p2620_p5 = scmp.lt.s32.totalorder %s2614_s27, %s2614_s27 }
   0xa   :  { %p2621_p6 = por %p2620_p5, %p2619_p4 }
   0xc   :  { %p2622_p7 = pnand %p2621_p6, %p2615_p3 }
   0xe   :  { %2625 = shalt.err (!%p2622_p7)
}
   0xf   :  { %s2629_s28 = smov 256   ;;  %s2630_s29 = smov 16  }
  0x10   :  { %24 = dma.hbm_to_vmem [thread:$0]  %s2801_s1, 25088, %s19_s19, [#allocation3], %s2629_s28, %s2629_s28, %s2630_s29  }
  0x11   :  { %2626 = dma.done.wait [#allocation3], 25088  }
  0x12   :  { %2627 = vsyncadd [#allocation3], 4294942208  ;;  %v2274_v0 = vld [vmem:[#allocation2 + $0x4] ss:$16 sps:$4 sm:$0xff]   ;;  %v2276_v1 = vld [vmem:[#allocation2 + $0xc] ss:$16 sps:$4 sm:$0xff]  }
  0x13   :  { %1251 = vmatprep.subr.bf16.mxu0 %v2274_v0  ;;  %v2278_v2 = vld [vmem:[#allocation2] ss:$16 sps:$4 sm:$0xff]   ;;  %v2279_v3 = vld [vmem:[#allocation2 + $0x8] ss:$16 sps:$4 sm:$0xff]   ;;  %1415 = vmatprep.subr.bf16.mxu1 %v2276_v1  ;;  %v2280_v4 = vld [vmem:[#allocation2 + $0x24] ss:$16 sps:$4 sm:$0xff]  }
  0x14   :  { %1252 = vmatpush1.bf16.msra.mxu0 %v2278_v2  ;;  %1416 = vmatpush1.bf16.msra.mxu1 %v2279_v3  ;;  %v2282_v5 = vld [vmem:[#allocation2 + $0x2c] ss:$16 sps:$4 sm:$0xff]   ;;  %v2284_v6 = vld [vmem:[#allocation2 + $0x20] ss:$16 sps:$4 sm:$0xff]   ;;  %v2285_v7 = vld [vmem:[#allocation2 + $0x28] ss:$16 sps:$4 sm:$0xff]  }
  0x15   :  { %1253 = vmatprep.subr.bf16.mxu0 %v2280_v4  ;;  %1417 = vmatprep.subr.bf16.mxu1 %v2282_v5  ;;  %v2286_v8 = vld [vmem:[#allocation2 + $0x44] ss:$16 sps:$4 sm:$0xff]   ;;  %v2288_v9 = vld [vmem:[#allocation2 + $0x4c] ss:$16 sps:$4 sm:$0xff]   ;;  %v2290_v10 = vld [vmem:[#allocation2 + $0x40] ss:$16 sps:$4 sm:$0xff]  }
  0x16   :  { %v2291_v11 = vld [vmem:[#allocation2 + $0x48] ss:$16 sps:$4 sm:$0xff]   ;;  %v2292_v12 = vld [vmem:[#allocation2 + $0x64] ss:$16 sps:$4 sm:$0xff]   ;;  %v2294_v13 = vld [vmem:[#allocation2 + $0x6c] ss:$16 sps:$4 sm:$0xff]  }
  0x17   :  { %v2296_v14 = vld [vmem:[#allocation2 + $0x60] ss:$16 sps:$4 sm:$0xff]   ;;  %v2297_v15 = vld [vmem:[#allocation2 + $0x68] ss:$16 sps:$4 sm:$0xff]   ;;  %v2298_v16 = vld [vmem:[#allocation2 + $0x84] ss:$16 sps:$4 sm:$0xff]  }
  0x18   :  { %1254 = vmatpush1.bf16.msra.mxu0 %v2284_v6  ;;  %1418 = vmatpush1.bf16.msra.mxu1 %v2285_v7  ;;  %v2300_v17 = vld [vmem:[#allocation2 + $0x8c] ss:$16 sps:$4 sm:$0xff]   ;;  %v2302_v18 = vld [vmem:[#allocation2 + $0x80] ss:$16 sps:$4 sm:$0xff]   ;;  %v2303_v19 = vld [vmem:[#allocation2 + $0x88] ss:$16 sps:$4 sm:$0xff]  }
  0x19   :  { %1255 = vmatprep.subr.bf16.mxu0 %v2286_v8  ;;  %1419 = vmatprep.subr.bf16.mxu1 %v2288_v9  ;;  %v2304_v20 = vld [vmem:[#allocation2 + $0xa4] ss:$16 sps:$4 sm:$0xff]   ;;  %v2306_v21 = vld [vmem:[#allocation2 + $0xac] ss:$16 sps:$4 sm:$0xff]   ;;  %v2308_v22 = vld [vmem:[#allocation2 + $0xa0] ss:$16 sps:$4 sm:$0xff]  }
  0x1a   :  { %v2309_v23 = vld [vmem:[#allocation2 + $0xa8] ss:$16 sps:$4 sm:$0xff]   ;;  %v2310_v24 = vld [vmem:[#allocation2 + $0xc4] ss:$16 sps:$4 sm:$0xff]   ;;  %v2312_v25 = vld [vmem:[#allocation2 + $0xcc] ss:$16 sps:$4 sm:$0xff]  }
  0x1b   :  { %v2314_v26 = vld [vmem:[#allocation2 + $0xc0] ss:$16 sps:$4 sm:$0xff]   ;;  %v2315_v27 = vld [vmem:[#allocation2 + $0xc8] ss:$16 sps:$4 sm:$0xff]   ;;  %v2316_v28 = vld [vmem:[#allocation2 + $0xe4] ss:$16 sps:$4 sm:$0xff]  }
  0x1c   :  { %1256 = vmatpush1.bf16.msra.mxu0 %v2290_v10  ;;  %1420 = vmatpush1.bf16.msra.mxu1 %v2291_v11  ;;  %v2318_v29 = vld [vmem:[#allocation2 + $0xec] ss:$16 sps:$4 sm:$0xff]   ;;  %v2320_v30 = vld [vmem:[#allocation2 + $0xe0] ss:$16 sps:$4 sm:$0xff]   ;;  %v2321_v31 = vld [vmem:[#allocation2 + $0xe8] ss:$16 sps:$4 sm:$0xff]  }
  0x1d   :  { %1257 = vmatprep.subr.bf16.mxu0 %v2292_v12  ;;  %1421 = vmatprep.subr.bf16.mxu1 %v2294_v13  ;;  %v2322_v32 = vld [vmem:[#allocation2 + $0x104] ss:$16 sps:$4 sm:$0xff]   ;;  %v2324_v33 = vld [vmem:[#allocation2 + $0x10c] ss:$16 sps:$4 sm:$0xff]   ;;  %v2326_v34 = vld [vmem:[#allocation2 + $0x100] ss:$16 sps:$4 sm:$0xff]  }
  0x1e   :  { %v2327_v35 = vld [vmem:[#allocation2 + $0x108] ss:$16 sps:$4 sm:$0xff]   ;;  %v2328_v36 = vld [vmem:[#allocation2 + $0x124] ss:$16 sps:$4 sm:$0xff]   ;;  %v2330_v37 = vld [vmem:[#allocation2 + $0x12c] ss:$16 sps:$4 sm:$0xff]  }
  0x1f   :  { %v2332_v38 = vld [vmem:[#allocation2 + $0x120] ss:$16 sps:$4 sm:$0xff]   ;;  %v2333_v39 = vld [vmem:[#allocation2 + $0x128] ss:$16 sps:$4 sm:$0xff]   ;;  %v2334_v40 = vld [vmem:[#allocation2 + $0x144] ss:$16 sps:$4 sm:$0xff]  }
  0x20   :  { %1258 = vmatpush1.bf16.msra.mxu0 %v2296_v14  ;;  %1422 = vmatpush1.bf16.msra.mxu1 %v2297_v15  ;;  %v2336_v41 = vld [vmem:[#allocation2 + $0x14c] ss:$16 sps:$4 sm:$0xff]   ;;  %v2338_v42 = vld [vmem:[#allocation2 + $0x140] ss:$16 sps:$4 sm:$0xff]   ;;  %v2339_v43 = vld [vmem:[#allocation2 + $0x148] ss:$16 sps:$4 sm:$0xff]  }
  0x21   :  { %1259 = vmatprep.subr.bf16.mxu0 %v2298_v16  ;;  %1423 = vmatprep.subr.bf16.mxu1 %v2300_v17  ;;  %v2340_v44 = vld [vmem:[#allocation2 + $0x164] ss:$16 sps:$4 sm:$0xff]   ;;  %v2342_v45 = vld [vmem:[#allocation2 + $0x16c] ss:$16 sps:$4 sm:$0xff]   ;;  %v2344_v47 = vld [vmem:[#allocation2 + $0x160] ss:$16 sps:$4 sm:$0xff]  }
  0x22   :  { %v36_v46 = vld [vmem:[%s2800_s0 + $0x8] sm:$0xff]  ;;  %v2346_v50 = vld [vmem:[#allocation2 + $0x184] ss:$16 sps:$4 sm:$0xff]   ;;  %v2350_v52 = vld [vmem:[#allocation2 + $0x180] ss:$16 sps:$4 sm:$0xff]   ;;  %vm1247_vm0 = vcmask 130048  }
  0x23   :  { %v43_v48 = vpack.c.bf16 %v36_v46, %v36_v46  ;;  %v2345_v49 = vld [vmem:[#allocation2 + $0x168] ss:$16 sps:$4 sm:$0xff]   ;;  %v2348_v51 = vld [vmem:[#allocation2 + $0x18c] ss:$16 sps:$4 sm:$0xff]   ;;  %v2352_v54 = vld [vmem:[#allocation2 + $0x1a4] ss:$16 sps:$4 sm:$0xff]  }
  0x24   :  { %1260 = vmatpush1.bf16.msra.mxu0 %v2302_v18  ;;  %1424 = vmatpush1.bf16.msra.mxu1 %v2303_v19  ;;  %v2351_v53 = vld [vmem:[#allocation2 + $0x188] ss:$16 sps:$4 sm:$0xff]   ;;  %v2354_v55 = vld [vmem:[#allocation2 + $0x1ac] ss:$16 sps:$4 sm:$0xff]   ;;  %v2356_v56 = vld [vmem:[#allocation2 + $0x1a0] ss:$16 sps:$4 sm:$0xff]  }
  0x25   :  { %1261 = vmatprep.subr.bf16.mxu0 %v2304_v20  ;;  %1425 = vmatprep.subr.bf16.mxu1 %v2306_v21  ;;  %v2357_v57 = vld [vmem:[#allocation2 + $0x1a8] ss:$16 sps:$4 sm:$0xff]   ;;  %v2358_v58 = vld [vmem:[#allocation2 + $0x1c4] ss:$16 sps:$4 sm:$0xff]   ;;  %v2360_v59 = vld [vmem:[#allocation2 + $0x1cc] ss:$16 sps:$4 sm:$0xff]  }
  0x26   :  { %1283 = vmatprep.mubr.bf16.mxu0 %v43_v48  ;;  %1447 = vmatprep.mubr.bf16.mxu1 %v43_v48  ;;  %v2362_v60 = vld [vmem:[#allocation2 + $0x1c0] ss:$16 sps:$4 sm:$0xff]   ;;  %v2363_v61 = vld [vmem:[#allocation2 + $0x1c8] ss:$16 sps:$4 sm:$0xff]   ;;  %v2364_v62 = vld [vmem:[#allocation2 + $0x1e4] ss:$16 sps:$4 sm:$0xff]  }
  0x27   :  { %v2366_v63 = vld [vmem:[#allocation2 + $0x1ec] ss:$16 sps:$4 sm:$0xff]   ;;  %v2368_v0 = vld [vmem:[#allocation2 + $0x1e0] ss:$16 sps:$4 sm:$0xff]   ;;  %v2369_v1 = vld [vmem:[#allocation2 + $0x1e8] ss:$16 sps:$4 sm:$0xff]  }
  0x28   :  { %1262 = vmatpush1.bf16.msra.mxu0 %v2308_v22  ;;  %1426 = vmatpush1.bf16.msra.mxu1 %v2309_v23  ;;  %v35_v2 = vld [vmem:[%s2800_s0] sm:$0xff]  ;;  %v2375_v4 = vld [vmem:[#allocation2 + $0x20c] ss:$16 sps:$4 sm:$0xff]   ;;  %v2373_v7 = vld [vmem:[#allocation2 + $0x208] ss:$16 sps:$4 sm:$0xff]  }
  0x29   :  { %1263 = vmatprep.subr.bf16.mxu0 %v2310_v24  ;;  %1427 = vmatprep.subr.bf16.mxu1 %v2312_v25  ;;  %v2372_v3 = vld [vmem:[#allocation2 + $0x204] ss:$16 sps:$4 sm:$0xff]   ;;  %v42_v5 = vpack.c.bf16 %v35_v2, %v35_v2  ;;  %v2370_v6 = vld [vmem:[#allocation2 + $0x200] ss:$16 sps:$4 sm:$0xff]   ;;  %v2381_v9 = vld [vmem:[#allocation2 + $0x22c] ss:$16 sps:$4 sm:$0xff]  }
  0x2a   :  { %v2378_v8 = vld [vmem:[#allocation2 + $0x224] ss:$16 sps:$4 sm:$0xff]   ;;  %v2376_v10 = vld [vmem:[#allocation2 + $0x220] ss:$16 sps:$4 sm:$0xff]   ;;  %v2379_v11 = vld [vmem:[#allocation2 + $0x228] ss:$16 sps:$4 sm:$0xff]  }
  0x2b   :  { %v2384_v12 = vld [vmem:[#allocation2 + $0x244] ss:$16 sps:$4 sm:$0xff]   ;;  %v2387_v13 = vld [vmem:[#allocation2 + $0x24c] ss:$16 sps:$4 sm:$0xff]   ;;  %v2382_v14 = vld [vmem:[#allocation2 + $0x240] ss:$16 sps:$4 sm:$0xff]  }
  0x2c   :  { %1264 = vmatpush1.bf16.msra.mxu0 %v2314_v26  ;;  %1428 = vmatpush1.bf16.msra.mxu1 %v2315_v27  ;;  %v2385_v15 = vld [vmem:[#allocation2 + $0x248] ss:$16 sps:$4 sm:$0xff]   ;;  %v2390_v16 = vld [vmem:[#allocation2 + $0x264] ss:$16 sps:$4 sm:$0xff]   ;;  %v2393_v17 = vld [vmem:[#allocation2 + $0x26c] ss:$16 sps:$4 sm:$0xff]  }
  0x2d   :  { %1265 = vmatprep.subr.bf16.mxu0 %v2316_v28  ;;  %1429 = vmatprep.subr.bf16.mxu1 %v2318_v29  ;;  %v2388_v18 = vld [vmem:[#allocation2 + $0x260] ss:$16 sps:$4 sm:$0xff]   ;;  %v2391_v19 = vld [vmem:[#allocation2 + $0x268] ss:$16 sps:$4 sm:$0xff]   ;;  %v2396_v20 = vld [vmem:[#allocation2 + $0x284] ss:$16 sps:$4 sm:$0xff]  }
  0x2e   :  { %v2399_v21 = vld [vmem:[#allocation2 + $0x28c] ss:$16 sps:$4 sm:$0xff]   ;;  %v2394_v22 = vld [vmem:[#allocation2 + $0x280] ss:$16 sps:$4 sm:$0xff]   ;;  %v2397_v23 = vld [vmem:[#allocation2 + $0x288] ss:$16 sps:$4 sm:$0xff]  }
  0x2f   :  { %v2402_v24 = vld [vmem:[#allocation2 + $0x2a4] ss:$16 sps:$4 sm:$0xff]   ;;  %v2405_v25 = vld [vmem:[#allocation2 + $0x2ac] ss:$16 sps:$4 sm:$0xff]   ;;  %v2400_v26 = vld [vmem:[#allocation2 + $0x2a0] ss:$16 sps:$4 sm:$0xff]  }
  0x30   :  { %1266 = vmatpush1.bf16.msra.mxu0 %v2320_v30  ;;  %1430 = vmatpush1.bf16.msra.mxu1 %v2321_v31  ;;  %v2403_v27 = vld [vmem:[#allocation2 + $0x2a8] ss:$16 sps:$4 sm:$0xff]   ;;  %v2408_v28 = vld [vmem:[#allocation2 + $0x2c4] ss:$16 sps:$4 sm:$0xff]   ;;  %v2411_v29 = vld [vmem:[#allocation2 + $0x2cc] ss:$16 sps:$4 sm:$0xff]  }
  0x31   :  { %1267 = vmatprep.subr.bf16.mxu0 %v2322_v32  ;;  %1431 = vmatprep.subr.bf16.mxu1 %v2324_v33  ;;  %v38_v30 = vld [vmem:[%s2800_s0 + $0x18] sm:$0xff]  ;;  %v2406_v31 = vld [vmem:[#allocation2 + $0x2c0] ss:$16 sps:$4 sm:$0xff]   ;;  %v2432_v46 = vld [vmem:[#allocation2 + $0x344] ss:$16 sps:$4 sm:$0xff]  }
  0x32   :  { %v45_v32 = vpack.c.bf16 %v38_v30, %v38_v30  ;;  %v2409_v33 = vld [vmem:[#allocation2 + $0x2c8] ss:$16 sps:$4 sm:$0xff]   ;;  %v2430_v48 = vld [vmem:[#allocation2 + $0x340] ss:$16 sps:$4 sm:$0xff]   ;;  %v2462_v2 = vld [vmem:[#allocation2 + $0x3e4] ss:$16 sps:$4 sm:$0xff]  }
  0x33   :  { %v2498_v30 = vld [vmem:[#allocation2 + $0x4a4] ss:$16 sps:$4 sm:$0xff]  }
  0x34   :  { %1268 = vmatpush1.bf16.msra.mxu0 %v2326_v34  ;;  %1432 = vmatpush1.bf16.msra.mxu1 %v2327_v35  ;;  %v2414_v34 = vld [vmem:[#allocation2 + $0x2e4] ss:$16 sps:$4 sm:$0xff]   ;;  %v2417_v35 = vld [vmem:[#allocation2 + $0x2ec] ss:$16 sps:$4 sm:$0xff]  }
  0x35   :  { %1269 = vmatprep.subr.bf16.mxu0 %v2328_v36  ;;  %1433 = vmatprep.subr.bf16.mxu1 %v2330_v37  ;;  %v2412_v36 = vld [vmem:[#allocation2 + $0x2e0] ss:$16 sps:$4 sm:$0xff]   ;;  %v2415_v37 = vld [vmem:[#allocation2 + $0x2e8] ss:$16 sps:$4 sm:$0xff]  }
  0x38   :  { %1270 = vmatpush1.bf16.msra.mxu0 %v2332_v38  ;;  %1434 = vmatpush1.bf16.msra.mxu1 %v2333_v39  ;;  %v2420_v38 = vld [vmem:[#allocation2 + $0x304] ss:$16 sps:$4 sm:$0xff]   ;;  %v2423_v39 = vld [vmem:[#allocation2 + $0x30c] ss:$16 sps:$4 sm:$0xff]  }
  0x39   :  { %1271 = vmatprep.subr.bf16.mxu0 %v2334_v40  ;;  %1435 = vmatprep.subr.bf16.mxu1 %v2336_v41  ;;  %v2418_v40 = vld [vmem:[#allocation2 + $0x300] ss:$16 sps:$4 sm:$0xff]   ;;  %v2421_v41 = vld [vmem:[#allocation2 + $0x308] ss:$16 sps:$4 sm:$0xff]  }
  0x3c   :  { %1272 = vmatpush1.bf16.msra.mxu0 %v2338_v42  ;;  %1436 = vmatpush1.bf16.msra.mxu1 %v2339_v43  ;;  %v2426_v42 = vld [vmem:[#allocation2 + $0x324] ss:$16 sps:$4 sm:$0xff]   ;;  %v2429_v43 = vld [vmem:[#allocation2 + $0x32c] ss:$16 sps:$4 sm:$0xff]  }
  0x3d   :  { %1273 = vmatprep.subr.bf16.mxu0 %v2340_v44  ;;  %1437 = vmatprep.subr.bf16.mxu1 %v2342_v45  ;;  %v2424_v44 = vld [vmem:[#allocation2 + $0x320] ss:$16 sps:$4 sm:$0xff]   ;;  %v2427_v45 = vld [vmem:[#allocation2 + $0x328] ss:$16 sps:$4 sm:$0xff]  }
  0x40   :  { %1274 = vmatpush1.bf16.msra.mxu0 %v2344_v47  ;;  %1438 = vmatpush1.bf16.msra.mxu1 %v2345_v49  ;;  %v2435_v47 = vld [vmem:[#allocation2 + $0x34c] ss:$16 sps:$4 sm:$0xff]   ;;  %v2433_v49 = vld [vmem:[#allocation2 + $0x348] ss:$16 sps:$4 sm:$0xff]  }
  0x41   :  { %1275 = vmatprep.subr.bf16.mxu0 %v2346_v50  ;;  %1439 = vmatprep.subr.bf16.mxu1 %v2348_v51  ;;  %v2438_v50 = vld [vmem:[#allocation2 + $0x364] ss:$16 sps:$4 sm:$0xff]   ;;  %v2441_v51 = vld [vmem:[#allocation2 + $0x36c] ss:$16 sps:$4 sm:$0xff]  }
  0x44   :  { %1276 = vmatpush1.bf16.msra.mxu0 %v2350_v52  ;;  %1440 = vmatpush1.bf16.msra.mxu1 %v2351_v53  ;;  %v2436_v52 = vld [vmem:[#allocation2 + $0x360] ss:$16 sps:$4 sm:$0xff]   ;;  %v2439_v53 = vld [vmem:[#allocation2 + $0x368] ss:$16 sps:$4 sm:$0xff]  }
  0x45   :  { %1277 = vmatprep.subr.bf16.mxu0 %v2352_v54  ;;  %1441 = vmatprep.subr.bf16.mxu1 %v2354_v55  ;;  %v2444_v54 = vld [vmem:[#allocation2 + $0x384] ss:$16 sps:$4 sm:$0xff]   ;;  %v2447_v55 = vld [vmem:[#allocation2 + $0x38c] ss:$16 sps:$4 sm:$0xff]  }
  0x48   :  { %1278 = vmatpush1.bf16.msra.mxu0 %v2356_v56  ;;  %1442 = vmatpush1.bf16.msra.mxu1 %v2357_v57  ;;  %v2442_v56 = vld [vmem:[#allocation2 + $0x380] ss:$16 sps:$4 sm:$0xff]   ;;  %v2445_v57 = vld [vmem:[#allocation2 + $0x388] ss:$16 sps:$4 sm:$0xff]  }
  0x49   :  { %1279 = vmatprep.subr.bf16.mxu0 %v2358_v58  ;;  %1443 = vmatprep.subr.bf16.mxu1 %v2360_v59  ;;  %v2450_v58 = vld [vmem:[#allocation2 + $0x3a4] ss:$16 sps:$4 sm:$0xff]   ;;  %v2453_v59 = vld [vmem:[#allocation2 + $0x3ac] ss:$16 sps:$4 sm:$0xff]  }
  0x4c   :  { %1280 = vmatpush1.bf16.msra.mxu0 %v2362_v60  ;;  %1444 = vmatpush1.bf16.msra.mxu1 %v2363_v61  ;;  %v2448_v60 = vld [vmem:[#allocation2 + $0x3a0] ss:$16 sps:$4 sm:$0xff]   ;;  %v2451_v61 = vld [vmem:[#allocation2 + $0x3a8] ss:$16 sps:$4 sm:$0xff]  }
  0x4d   :  { %1281 = vmatprep.subr.bf16.mxu0 %v2364_v62  ;;  %1445 = vmatprep.subr.bf16.mxu1 %v2366_v63  ;;  %v2456_v62 = vld [vmem:[#allocation2 + $0x3c4] ss:$16 sps:$4 sm:$0xff]   ;;  %v2459_v63 = vld [vmem:[#allocation2 + $0x3cc] ss:$16 sps:$4 sm:$0xff]  }
  0x50   :  { %1282 = vmatpush1.bf16.msra.mxu0 %v2368_v0  ;;  %1446 = vmatpush1.bf16.msra.mxu1 %v2369_v1  ;;  %v2454_v0 = vld [vmem:[#allocation2 + $0x3c0] ss:$16 sps:$4 sm:$0xff]   ;;  %v2457_v1 = vld [vmem:[#allocation2 + $0x3c8] ss:$16 sps:$4 sm:$0xff]  }
  0x51   :  { %1292 = vmatprep.subr.bf16.mxu0 %v2372_v3  ;;  %1456 = vmatprep.subr.bf16.mxu1 %v2375_v4  ;;  %v2465_v3 = vld [vmem:[#allocation2 + $0x3ec] ss:$16 sps:$4 sm:$0xff]   ;;  %v2460_v4 = vld [vmem:[#allocation2 + $0x3e0] ss:$16 sps:$4 sm:$0xff]  }
  0x53   :  { %1284 = vmatmul.mubr.bf16.vlgmr.msra.gmra.mrb[0].mxu0 %v42_v5  ;;  %1448 = vmatmul.mubr.bf16.vlgmr.msra.gmra.mrb[0].mxu1 %v42_v5  ;;  %v2463_v5 = vld [vmem:[#allocation2 + $0x3e8] ss:$16 sps:$4 sm:$0xff]  }
  0x54   :  { %1293 = vmatpush1.bf16.msra.mxu0 %v2370_v6  ;;  %1457 = vmatpush1.bf16.msra.mxu1 %v2373_v7  ;;  %v2468_v6 = vld [vmem:[#allocation2 + $0x404] ss:$16 sps:$4 sm:$0xff]  }
  0x55   :  { %1294 = vmatprep.subr.bf16.mxu0 %v2378_v8  ;;  %1458 = vmatprep.subr.bf16.mxu1 %v2381_v9  ;;  %v37_v7 = vld [vmem:[%s2800_s0 + $0x10] sm:$0xff]  ;;  %v2471_v8 = vld [vmem:[#allocation2 + $0x40c] ss:$16 sps:$4 sm:$0xff]  }
  0x56   :  { %1324 = vmatprep.mubr.bf16.mxu0 %v45_v32  ;;  %1488 = vmatprep.mubr.bf16.mxu1 %v45_v32  ;;  %v2466_v9 = vld [vmem:[#allocation2 + $0x400] ss:$16 sps:$4 sm:$0xff]  }
  0x57   :  { %v2496_v32 = vld [vmem:[#allocation2 + $0x4a0] ss:$16 sps:$4 sm:$0xff]  }
  0x58   :  { %1295 = vmatpush1.bf16.msra.mxu0 %v2376_v10  ;;  %1459 = vmatpush1.bf16.msra.mxu1 %v2379_v11  ;;  %v44_v10 = vpack.c.bf16 %v37_v7, %v37_v7  ;;  %v2469_v11 = vld [vmem:[#allocation2 + $0x408] ss:$16 sps:$4 sm:$0xff]   ;;  %v2561_v7 = vld [vmem:[#allocation2 + $0x5ec] ss:$16 sps:$4 sm:$0xff]  }
  0x59   :  { %1296 = vmatprep.subr.bf16.mxu0 %v2384_v12  ;;  %1460 = vmatprep.subr.bf16.mxu1 %v2387_v13  ;;  %v2474_v12 = vld [vmem:[#allocation2 + $0x424] ss:$16 sps:$4 sm:$0xff]   ;;  %v2477_v13 = vld [vmem:[#allocation2 + $0x42c] ss:$16 sps:$4 sm:$0xff]  }
  0x5c   :  { %1297 = vmatpush1.bf16.msra.mxu0 %v2382_v14  ;;  %1461 = vmatpush1.bf16.msra.mxu1 %v2385_v15  ;;  %v40_v14 = vld [vmem:[%s2800_s0 + $0x28] sm:$0xff] }
  0x5d   :  { %1298 = vmatprep.subr.bf16.mxu0 %v2390_v16  ;;  %1462 = vmatprep.subr.bf16.mxu1 %v2393_v17  ;;  %v47_v15 = vpack.c.bf16 %v40_v14, %v40_v14  ;;  %v2472_v16 = vld [vmem:[#allocation2 + $0x420] ss:$16 sps:$4 sm:$0xff]   ;;  %v2475_v17 = vld [vmem:[#allocation2 + $0x428] ss:$16 sps:$4 sm:$0xff]  }
  0x5e   :  { %v2562_v14 = vld [vmem:[#allocation2 + $0x600] ss:$16 sps:$4 sm:$0xff]  }
  0x60   :  { %1299 = vmatpush1.bf16.msra.mxu0 %v2388_v18  ;;  %1463 = vmatpush1.bf16.msra.mxu1 %v2391_v19  ;;  %v2480_v18 = vld [vmem:[#allocation2 + $0x444] ss:$16 sps:$4 sm:$0xff]   ;;  %v2483_v19 = vld [vmem:[#allocation2 + $0x44c] ss:$16 sps:$4 sm:$0xff]  }
  0x61   :  { %1300 = vmatprep.subr.bf16.mxu0 %v2396_v20  ;;  %1464 = vmatprep.subr.bf16.mxu1 %v2399_v21  ;;  %v2478_v20 = vld [vmem:[#allocation2 + $0x440] ss:$16 sps:$4 sm:$0xff]   ;;  %v2481_v21 = vld [vmem:[#allocation2 + $0x448] ss:$16 sps:$4 sm:$0xff]  }
  0x64   :  { %1301 = vmatpush1.bf16.msra.mxu0 %v2394_v22  ;;  %1465 = vmatpush1.bf16.msra.mxu1 %v2397_v23  ;;  %v2486_v22 = vld [vmem:[#allocation2 + $0x464] ss:$16 sps:$4 sm:$0xff]   ;;  %v2489_v23 = vld [vmem:[#allocation2 + $0x46c] ss:$16 sps:$4 sm:$0xff]  }
  0x65   :  { %1302 = vmatprep.subr.bf16.mxu0 %v2402_v24  ;;  %1466 = vmatprep.subr.bf16.mxu1 %v2405_v25  ;;  %v2484_v24 = vld [vmem:[#allocation2 + $0x460] ss:$16 sps:$4 sm:$0xff]   ;;  %v2487_v25 = vld [vmem:[#allocation2 + $0x468] ss:$16 sps:$4 sm:$0xff]  }
  0x68   :  { %1303 = vmatpush1.bf16.msra.mxu0 %v2400_v26  ;;  %1467 = vmatpush1.bf16.msra.mxu1 %v2403_v27  ;;  %v2492_v26 = vld [vmem:[#allocation2 + $0x484] ss:$16 sps:$4 sm:$0xff]   ;;  %v2495_v27 = vld [vmem:[#allocation2 + $0x48c] ss:$16 sps:$4 sm:$0xff]  }
  0x69   :  { %1304 = vmatprep.subr.bf16.mxu0 %v2408_v28  ;;  %1468 = vmatprep.subr.bf16.mxu1 %v2411_v29  ;;  %v2490_v28 = vld [vmem:[#allocation2 + $0x480] ss:$16 sps:$4 sm:$0xff]   ;;  %v2493_v29 = vld [vmem:[#allocation2 + $0x488] ss:$16 sps:$4 sm:$0xff]  }
  0x6c   :  { %1305 = vmatpush1.bf16.msra.mxu0 %v2406_v31  ;;  %1469 = vmatpush1.bf16.msra.mxu1 %v2409_v33  ;;  %v2501_v31 = vld [vmem:[#allocation2 + $0x4ac] ss:$16 sps:$4 sm:$0xff]   ;;  %v2499_v33 = vld [vmem:[#allocation2 + $0x4a8] ss:$16 sps:$4 sm:$0xff]  }
  0x6d   :  { %1306 = vmatprep.subr.bf16.mxu0 %v2414_v34  ;;  %1470 = vmatprep.subr.bf16.mxu1 %v2417_v35  ;;  %v2504_v34 = vld [vmem:[#allocation2 + $0x4c4] ss:$16 sps:$4 sm:$0xff]   ;;  %v2507_v35 = vld [vmem:[#allocation2 + $0x4cc] ss:$16 sps:$4 sm:$0xff]  }
  0x70   :  { %1307 = vmatpush1.bf16.msra.mxu0 %v2412_v36  ;;  %1471 = vmatpush1.bf16.msra.mxu1 %v2415_v37  ;;  %v2502_v36 = vld [vmem:[#allocation2 + $0x4c0] ss:$16 sps:$4 sm:$0xff]   ;;  %v2505_v37 = vld [vmem:[#allocation2 + $0x4c8] ss:$16 sps:$4 sm:$0xff]  }
  0x71   :  { %1308 = vmatprep.subr.bf16.mxu0 %v2420_v38  ;;  %1472 = vmatprep.subr.bf16.mxu1 %v2423_v39  ;;  %v2510_v38 = vld [vmem:[#allocation2 + $0x4e4] ss:$16 sps:$4 sm:$0xff]   ;;  %v2513_v39 = vld [vmem:[#allocation2 + $0x4ec] ss:$16 sps:$4 sm:$0xff]  }
  0x74   :  { %1309 = vmatpush1.bf16.msra.mxu0 %v2418_v40  ;;  %1473 = vmatpush1.bf16.msra.mxu1 %v2421_v41  ;;  %v2508_v40 = vld [vmem:[#allocation2 + $0x4e0] ss:$16 sps:$4 sm:$0xff]   ;;  %v2511_v41 = vld [vmem:[#allocation2 + $0x4e8] ss:$16 sps:$4 sm:$0xff]  }
  0x75   :  { %1310 = vmatprep.subr.bf16.mxu0 %v2426_v42  ;;  %1474 = vmatprep.subr.bf16.mxu1 %v2429_v43  ;;  %v2516_v42 = vld [vmem:[#allocation2 + $0x504] ss:$16 sps:$4 sm:$0xff]   ;;  %v2519_v43 = vld [vmem:[#allocation2 + $0x50c] ss:$16 sps:$4 sm:$0xff]  }
  0x78   :  { %1311 = vmatpush1.bf16.msra.mxu0 %v2424_v44  ;;  %1475 = vmatpush1.bf16.msra.mxu1 %v2427_v45  ;;  %v2514_v44 = vld [vmem:[#allocation2 + $0x500] ss:$16 sps:$4 sm:$0xff]   ;;  %v2517_v45 = vld [vmem:[#allocation2 + $0x508] ss:$16 sps:$4 sm:$0xff]  }
  0x79   :  { %1312 = vmatprep.subr.bf16.mxu0 %v2432_v46  ;;  %1476 = vmatprep.subr.bf16.mxu1 %v2435_v47  ;;  %v2522_v46 = vld [vmem:[#allocation2 + $0x524] ss:$16 sps:$4 sm:$0xff]   ;;  %v2525_v47 = vld [vmem:[#allocation2 + $0x52c] ss:$16 sps:$4 sm:$0xff]  }
  0x7c   :  { %1313 = vmatpush1.bf16.msra.mxu0 %v2430_v48  ;;  %1477 = vmatpush1.bf16.msra.mxu1 %v2433_v49  ;;  %v2520_v48 = vld [vmem:[#allocation2 + $0x520] ss:$16 sps:$4 sm:$0xff]   ;;  %v2523_v49 = vld [vmem:[#allocation2 + $0x528] ss:$16 sps:$4 sm:$0xff]  }
  0x7d   :  { %1314 = vmatprep.subr.bf16.mxu0 %v2438_v50  ;;  %1478 = vmatprep.subr.bf16.mxu1 %v2441_v51  ;;  %v2528_v50 = vld [vmem:[#allocation2 + $0x544] ss:$16 sps:$4 sm:$0xff]   ;;  %v2531_v51 = vld [vmem:[#allocation2 + $0x54c] ss:$16 sps:$4 sm:$0xff]  }
  0x80   :  { %1315 = vmatpush1.bf16.msra.mxu0 %v2436_v52  ;;  %1479 = vmatpush1.bf16.msra.mxu1 %v2439_v53  ;;  %v2526_v52 = vld [vmem:[#allocation2 + $0x540] ss:$16 sps:$4 sm:$0xff]   ;;  %v2529_v53 = vld [vmem:[#allocation2 + $0x548] ss:$16 sps:$4 sm:$0xff]  }
  0x81   :  { %1316 = vmatprep.subr.bf16.mxu0 %v2444_v54  ;;  %1480 = vmatprep.subr.bf16.mxu1 %v2447_v55  ;;  %v2534_v54 = vld [vmem:[#allocation2 + $0x564] ss:$16 sps:$4 sm:$0xff]   ;;  %v2537_v55 = vld [vmem:[#allocation2 + $0x56c] ss:$16 sps:$4 sm:$0xff]  }
  0x84   :  { %1317 = vmatpush1.bf16.msra.mxu0 %v2442_v56  ;;  %1481 = vmatpush1.bf16.msra.mxu1 %v2445_v57  ;;  %v2532_v56 = vld [vmem:[#allocation2 + $0x560] ss:$16 sps:$4 sm:$0xff]   ;;  %v2535_v57 = vld [vmem:[#allocation2 + $0x568] ss:$16 sps:$4 sm:$0xff]  }
  0x85   :  { %1318 = vmatprep.subr.bf16.mxu0 %v2450_v58  ;;  %1482 = vmatprep.subr.bf16.mxu1 %v2453_v59  ;;  %v2540_v58 = vld [vmem:[#allocation2 + $0x584] ss:$16 sps:$4 sm:$0xff]   ;;  %v2543_v59 = vld [vmem:[#allocation2 + $0x58c] ss:$16 sps:$4 sm:$0xff]  }
  0x88   :  { %1319 = vmatpush1.bf16.msra.mxu0 %v2448_v60  ;;  %1483 = vmatpush1.bf16.msra.mxu1 %v2451_v61  ;;  %v2538_v60 = vld [vmem:[#allocation2 + $0x580] ss:$16 sps:$4 sm:$0xff]   ;;  %v2541_v61 = vld [vmem:[#allocation2 + $0x588] ss:$16 sps:$4 sm:$0xff]  }
  0x89   :  { %1320 = vmatprep.subr.bf16.mxu0 %v2456_v62  ;;  %1484 = vmatprep.subr.bf16.mxu1 %v2459_v63  ;;  %v2546_v62 = vld [vmem:[#allocation2 + $0x5a4] ss:$16 sps:$4 sm:$0xff]   ;;  %v2549_v63 = vld [vmem:[#allocation2 + $0x5ac] ss:$16 sps:$4 sm:$0xff]  }
  0x8c   :  { %1321 = vmatpush1.bf16.msra.mxu0 %v2454_v0  ;;  %1485 = vmatpush1.bf16.msra.mxu1 %v2457_v1  ;;  %v2544_v0 = vld [vmem:[#allocation2 + $0x5a0] ss:$16 sps:$4 sm:$0xff]   ;;  %v2547_v1 = vld [vmem:[#allocation2 + $0x5a8] ss:$16 sps:$4 sm:$0xff]  }
  0x8d   :  { %1322 = vmatprep.subr.bf16.mxu0 %v2462_v2  ;;  %1486 = vmatprep.subr.bf16.mxu1 %v2465_v3  ;;  %v2552_v2 = vld [vmem:[#allocation2 + $0x5c4] ss:$16 sps:$4 sm:$0xff]   ;;  %v2555_v3 = vld [vmem:[#allocation2 + $0x5cc] ss:$16 sps:$4 sm:$0xff]  }
  0x90   :  { %1323 = vmatpush1.bf16.msra.mxu0 %v2460_v4  ;;  %1487 = vmatpush1.bf16.msra.mxu1 %v2463_v5  ;;  %v2550_v4 = vld [vmem:[#allocation2 + $0x5c0] ss:$16 sps:$4 sm:$0xff]   ;;  %v2553_v5 = vld [vmem:[#allocation2 + $0x5c8] ss:$16 sps:$4 sm:$0xff]  }
  0x91   :  { %1333 = vmatprep.subr.bf16.mxu0 %v2468_v6  ;;  %1497 = vmatprep.subr.bf16.mxu1 %v2471_v8  ;;  %v2558_v6 = vld [vmem:[#allocation2 + $0x5e4] ss:$16 sps:$4 sm:$0xff]   ;;  %v2556_v8 = vld [vmem:[#allocation2 + $0x5e0] ss:$16 sps:$4 sm:$0xff]  }
  0x93   :  { %1325 = vmatmul.mubr.bf16.vlgmr.msra.gmra.mrb[0].mxu0 %v44_v10  ;;  %1489 = vmatmul.mubr.bf16.vlgmr.msra.gmra.mrb[0].mxu1 %v44_v10  ;;  %v39_v10 = vld [vmem:[%s2800_s0 + $0x20] sm:$0xff] }
  0x94   :  { %1334 = vmatpush1.bf16.msra.mxu0 %v2466_v9  ;;  %1498 = vmatpush1.bf16.msra.mxu1 %v2469_v11  ;;  %v2559_v9 = vld [vmem:[#allocation2 + $0x5e8] ss:$16 sps:$4 sm:$0xff]   ;;  %v2564_v11 = vld [vmem:[#allocation2 + $0x604] ss:$16 sps:$4 sm:$0xff]  }
  0x95   :  { %1335 = vmatprep.subr.bf16.mxu0 %v2474_v12  ;;  %1499 = vmatprep.subr.bf16.mxu1 %v2477_v13  ;;  %v2567_v12 = vld [vmem:[#allocation2 + $0x60c] ss:$16 sps:$4 sm:$0xff]   ;;  %v46_v13 = vpack.c.bf16 %v39_v10, %v39_v10 }
  0x96   :  { %1365 = vmatprep.mubr.bf16.mxu0 %v47_v15  ;;  %1529 = vmatprep.mubr.bf16.mxu1 %v47_v15  ;;  %v2565_v15 = vld [vmem:[#allocation2 + $0x608] ss:$16 sps:$4 sm:$0xff]  }
  0x98   :  { %1336 = vmatpush1.bf16.msra.mxu0 %v2472_v16  ;;  %1500 = vmatpush1.bf16.msra.mxu1 %v2475_v17  ;;  %v2568_v16 = vld [vmem:[%s2803_s3 + $0x40] sm:$0xff]  }
  0x99   :  { %1337 = vmatprep.subr.bf16.mxu0 %v2480_v18  ;;  %1501 = vmatprep.subr.bf16.mxu1 %v2483_v19  ;;  %v2569_v17 = vld [vmem:[%s2803_s3 + $0xc0] sm:$0xff]   ;;  %v2631_v18 = vmov 0   ;;  %v41_v19 = vld [vmem:[%s2800_s0 + $0x30] sm:$0xff] }
  0x9c   :  { %1338 = vmatpush1.bf16.msra.mxu0 %v2478_v20  ;;  %1502 = vmatpush1.bf16.msra.mxu1 %v2481_v21  ;;  %v48_v20 = vpack.c.bf16 %v41_v19, %v41_v19  ;;  %v2570_v21 = vld [vmem:[%s2803_s3] sm:$0xff]  }
  0x9d   :  { %1339 = vmatprep.subr.bf16.mxu0 %v2486_v22  ;;  %1503 = vmatprep.subr.bf16.mxu1 %v2489_v23  ;;  %v2571_v22 = vld [vmem:[%s2803_s3 + $0x80] sm:$0xff]   ;;  %v2572_v23 = vld [vmem:[%s2803_s3 + $0x48] sm:$0xff]  }
  0xa0   :  { %1340 = vmatpush1.bf16.msra.mxu0 %v2484_v24  ;;  %1504 = vmatpush1.bf16.msra.mxu1 %v2487_v25  ;;  %v2573_v24 = vld [vmem:[%s2803_s3 + $0xc8] sm:$0xff]  }
  0xa1   :  { %1341 = vmatprep.subr.bf16.mxu0 %v2492_v26  ;;  %1505 = vmatprep.subr.bf16.mxu1 %v2495_v27  ;;  %v2574_v25 = vld [vmem:[%s2803_s3 + $0x8] sm:$0xff]   ;;  %v2576_v27 = vld [vmem:[%s2803_s3 + $0x50] sm:$0xff]  }
  0xa2   :  { %v2575_v26 = vld [vmem:[%s2803_s3 + $0x88] sm:$0xff]  }
  0xa4   :  { %1342 = vmatpush1.bf16.msra.mxu0 %v2490_v28  ;;  %1506 = vmatpush1.bf16.msra.mxu1 %v2493_v29  ;;  %v2577_v28 = vld [vmem:[%s2803_s3 + $0xd0] sm:$0xff]  }
  0xa5   :  { %1343 = vmatprep.subr.bf16.mxu0 %v2498_v30  ;;  %1507 = vmatprep.subr.bf16.mxu1 %v2501_v31  ;;  %v2578_v29 = vld [vmem:[%s2803_s3 + $0x10] sm:$0xff]   ;;  %v2580_v31 = vld [vmem:[%s2803_s3 + $0x58] sm:$0xff]  }
  0xa6   :  { %v2579_v30 = vld [vmem:[%s2803_s3 + $0x90] sm:$0xff]  }
  0xa8   :  { %1344 = vmatpush1.bf16.msra.mxu0 %v2496_v32  ;;  %1508 = vmatpush1.bf16.msra.mxu1 %v2499_v33  ;;  %v2581_v32 = vld [vmem:[%s2803_s3 + $0xd8] sm:$0xff]  }
  0xa9   :  { %1345 = vmatprep.subr.bf16.mxu0 %v2504_v34  ;;  %1509 = vmatprep.subr.bf16.mxu1 %v2507_v35  ;;  %v2582_v33 = vld [vmem:[%s2803_s3 + $0x18] sm:$0xff]   ;;  %v2584_v35 = vld [vmem:[%s2803_s3 + $0x60] sm:$0xff]  }
  0xaa   :  { %v2583_v34 = vld [vmem:[%s2803_s3 + $0x98] sm:$0xff]  }
  0xac   :  { %1346 = vmatpush1.bf16.msra.mxu0 %v2502_v36  ;;  %1510 = vmatpush1.bf16.msra.mxu1 %v2505_v37  ;;  %v2585_v36 = vld [vmem:[%s2803_s3 + $0xe0] sm:$0xff]  }
  0xad   :  { %1347 = vmatprep.subr.bf16.mxu0 %v2510_v38  ;;  %1511 = vmatprep.subr.bf16.mxu1 %v2513_v39  ;;  %v2586_v37 = vld [vmem:[%s2803_s3 + $0x20] sm:$0xff]   ;;  %v2588_v39 = vld [vmem:[%s2803_s3 + $0x68] sm:$0xff]  }
  0xae   :  { %v2587_v38 = vld [vmem:[%s2803_s3 + $0xa0] sm:$0xff]  }
  0xb0   :  { %1348 = vmatpush1.bf16.msra.mxu0 %v2508_v40  ;;  %1512 = vmatpush1.bf16.msra.mxu1 %v2511_v41  ;;  %v2589_v40 = vld [vmem:[%s2803_s3 + $0xe8] sm:$0xff]  }
  0xb1   :  { %1349 = vmatprep.subr.bf16.mxu0 %v2516_v42  ;;  %1513 = vmatprep.subr.bf16.mxu1 %v2519_v43  ;;  %v2590_v41 = vld [vmem:[%s2803_s3 + $0x28] sm:$0xff]   ;;  %v2592_v43 = vld [vmem:[%s2803_s3 + $0x70] sm:$0xff]  }
  0xb2   :  { %v2591_v42 = vld [vmem:[%s2803_s3 + $0xa8] sm:$0xff]  }
  0xb4   :  { %1350 = vmatpush1.bf16.msra.mxu0 %v2514_v44  ;;  %1514 = vmatpush1.bf16.msra.mxu1 %v2517_v45  ;;  %v2593_v44 = vld [vmem:[%s2803_s3 + $0xf0] sm:$0xff]  }
  0xb5   :  { %1351 = vmatprep.subr.bf16.mxu0 %v2522_v46  ;;  %1515 = vmatprep.subr.bf16.mxu1 %v2525_v47  ;;  %v2594_v45 = vld [vmem:[%s2803_s3 + $0x30] sm:$0xff]   ;;  %v2596_v47 = vld [vmem:[%s2803_s3 + $0x78] sm:$0xff]  }
  0xb6   :  { %v2595_v46 = vld [vmem:[%s2803_s3 + $0xb0] sm:$0xff]  }
  0xb8   :  { %1352 = vmatpush1.bf16.msra.mxu0 %v2520_v48  ;;  %1516 = vmatpush1.bf16.msra.mxu1 %v2523_v49  ;;  %v2597_v48 = vld [vmem:[%s2803_s3 + $0xf8] sm:$0xff]  }
  0xb9   :  { %1353 = vmatprep.subr.bf16.mxu0 %v2528_v50  ;;  %1517 = vmatprep.subr.bf16.mxu1 %v2531_v51  ;;  %v2598_v49 = vld [vmem:[%s2803_s3 + $0x38] sm:$0xff]   ;;  %v247_v51 = vlaneseq }
  0xba   :  { %v2599_v50 = vld [vmem:[%s2803_s3 + $0xb8] sm:$0xff]  }
  0xbc   :  { %1354 = vmatpush1.bf16.msra.mxu0 %v2526_v52  ;;  %1518 = vmatpush1.bf16.msra.mxu1 %v2529_v53  ;;  %v248_v52 = vshrl.u32 %v247_v51, 7 }
  0xbd   :  { %1355 = vmatprep.subr.bf16.mxu0 %v2534_v54  ;;  %1519 = vmatprep.subr.bf16.mxu1 %v2537_v55  ;;  %v245_v55 = vld [vmem:[%s2802_s2] sm:$0xf] }
  0xbe   :  { %v249_v53 = vsub.s32 0, %v248_v52  ;;  %v257_v54 = vsub.s32 2, %v248_v52 }
  0xc0   :  { %1356 = vmatpush1.bf16.msra.mxu0 %v2532_v56  ;;  %1520 = vmatpush1.bf16.msra.mxu1 %v2535_v57  ;;  %v253_v56 = vsub.s32 1, %v248_v52  ;;  %v261_v57 = vsub.s32 3, %v248_v52 }
  0xc1   :  { %1357 = vmatprep.subr.bf16.mxu0 %v2540_v58  ;;  %1521 = vmatprep.subr.bf16.mxu1 %v2543_v59  ;;  %v250_v58 = vrot.slane %v245_v55, %v249_v53  ;;  %v258_v59 = vrot.slane %v245_v55, %v257_v54 }
  0xc4   :  { %1358 = vmatpush1.bf16.msra.mxu0 %v2538_v60  ;;  %1522 = vmatpush1.bf16.msra.mxu1 %v2541_v61  ;;  %v254_v60 = vrot.slane %v245_v55, %v253_v56  ;;  %v262_v61 = vrot.slane %v245_v55, %v261_v57 }
  0xc5   :  { %1359 = vmatprep.subr.bf16.mxu0 %v2546_v62  ;;  %1523 = vmatprep.subr.bf16.mxu1 %v2549_v63 }
  0xc8   :  { %1360 = vmatpush1.bf16.msra.mxu0 %v2544_v0  ;;  %1524 = vmatpush1.bf16.msra.mxu1 %v2547_v1 }
  0xc9   :  { %1361 = vmatprep.subr.bf16.mxu0 %v2552_v2  ;;  %1525 = vmatprep.subr.bf16.mxu1 %v2555_v3 }
  0xcc   :  { %1362 = vmatpush1.bf16.msra.mxu0 %v2550_v4  ;;  %1526 = vmatpush1.bf16.msra.mxu1 %v2553_v5 }
  0xcd   :  { %1363 = vmatprep.subr.bf16.mxu0 %v2558_v6  ;;  %1527 = vmatprep.subr.bf16.mxu1 %v2561_v7 }
  0xd0   :  { %1364 = vmatpush1.bf16.msra.mxu0 %v2556_v8  ;;  %1528 = vmatpush1.bf16.msra.mxu1 %v2559_v9 }
  0xd1   :  { %1374 = vmatprep.subr.bf16.mxu0 %v2564_v11  ;;  %1538 = vmatprep.subr.bf16.mxu1 %v2567_v12 }
  0xd3   :  { %1366 = vmatmul.mubr.bf16.vlgmr.msra.gmra.mrb[0].mxu0 %v46_v13  ;;  %1530 = vmatmul.mubr.bf16.vlgmr.msra.gmra.mrb[0].mxu1 %v46_v13 }
  0xd4   :  { %1375 = vmatpush1.bf16.msra.mxu0 %v2562_v14  ;;  %1539 = vmatpush1.bf16.msra.mxu1 %v2565_v15 }
  0xd5   :  { %1406 = vmatprep.mubr.bf16.mxu0 %v2631_v18  ;;  %1570 = vmatprep.mubr.bf16.mxu1 %v2631_v18 }
  0xd6   :  { %2194 = vmatprep.subr.bf16.mxu0 %v2568_v16  ;;  %2216 = vmatprep.subr.bf16.mxu1 %v2569_v17 }
  0xdf   :  { %2159 = vmatmul.mubr.msk.bf16.vlgmr.msra.gmra.mrb[0].mxu0 %vm1247_vm0, %v48_v20  ;;  %2160 = vmatmul.mubr.msk.bf16.vlgmr.msra.gmra.mrb[0].mxu1 %vm1247_vm0, %v48_v20 }
  0xe0   :  { %2195 = vmatpush3.bf16.msra.mxu0 %v2570_v21  ;;  %2217 = vmatpush3.bf16.msra.mxu1 %v2571_v22 }
  0xe1   :  { %2196 = vmatprep.subr.bf16.mxu0 %v2572_v23  ;;  %2218 = vmatprep.subr.bf16.mxu1 %v2573_v24 }
  0xe4   :  { %2197 = vmatpush3.bf16.msra.mxu0 %v2574_v25  ;;  %2219 = vmatpush3.bf16.msra.mxu1 %v2575_v26 }
  0xe5   :  { %2198 = vmatprep.subr.bf16.mxu0 %v2576_v27  ;;  %2220 = vmatprep.subr.bf16.mxu1 %v2577_v28 }
  0xe8   :  { %2199 = vmatpush3.bf16.msra.mxu0 %v2578_v29  ;;  %2221 = vmatpush3.bf16.msra.mxu1 %v2579_v30 }
  0xe9   :  { %2200 = vmatprep.subr.bf16.mxu0 %v2580_v31  ;;  %2222 = vmatprep.subr.bf16.mxu1 %v2581_v32 }
  0xec   :  { %2201 = vmatpush3.bf16.msra.mxu0 %v2582_v33  ;;  %2223 = vmatpush3.bf16.msra.mxu1 %v2583_v34 }
  0xed   :  { %2202 = vmatprep.subr.bf16.mxu0 %v2584_v35  ;;  %2224 = vmatprep.subr.bf16.mxu1 %v2585_v36  ;;  %v2161_v36 = vld [vmem:[%s2804_s4] ss:$0 sm:$0xff] }
  0xf0   :  { %2203 = vmatpush3.bf16.msra.mxu0 %v2586_v37  ;;  %2225 = vmatpush3.bf16.msra.mxu1 %v2587_v38 }
  0xf1   :  { %2204 = vmatprep.subr.bf16.mxu0 %v2588_v39  ;;  %2226 = vmatprep.subr.bf16.mxu1 %v2589_v40 }
  0xf4   :  { %2205 = vmatpush3.bf16.msra.mxu0 %v2590_v41  ;;  %2227 = vmatpush3.bf16.msra.mxu1 %v2591_v42 }
  0xf5   :  { %2206 = vmatprep.subr.bf16.mxu0 %v2592_v43  ;;  %2228 = vmatprep.subr.bf16.mxu1 %v2593_v44 }
  0xf8   :  { %2207 = vmatpush3.bf16.msra.mxu0 %v2594_v45  ;;  %2229 = vmatpush3.bf16.msra.mxu1 %v2595_v46 }
  0xf9   :  { %2208 = vmatprep.subr.bf16.mxu0 %v2596_v47  ;;  %2230 = vmatprep.subr.bf16.mxu1 %v2597_v48 }
  0xfc   :  { %2209 = vmatpush3.bf16.msra.mxu0 %v2598_v49  ;;  %2231 = vmatpush3.bf16.msra.mxu1 %v2599_v50 }
 0x1b2   :  { %v1408_v62 = vpop.f32.mrb[0].mxu0  ;;  %v1572_v63 = vpop.f32.mrb[0].mxu1 }
 0x1b3   :  { %v2238_v0 = vadd.f32 %v1408_v62, %v250_v58  ;;  %v2240_v1 = vadd.f32 %v1572_v63, %v258_v59  ;;  %v1410_v2 = vpop.f32.mrb[1].mxu0  ;;  %v1574_v3 = vpop.f32.mrb[1].mxu1 }
 0x1b4   :  { %v2239_v4 = vadd.f32 %v1410_v2, %v254_v60  ;;  %v2241_v5 = vadd.f32 %v1574_v3, %v262_v61  ;;  %v1412_v6 = vpop.f32.mrb[2].mxu0  ;;  %v1576_v7 = vpop.f32.mrb[2].mxu1 }
 0x1b5   :  { %v1579_v8 = vmax.f32 %v2238_v0, 0.0  ;;  %v1581_v9 = vmax.f32 %v2240_v1, 0.0  ;;  %v1413_v10 = vpop.f32.mrb[3].mxu0  ;;  %v1577_v11 = vpop.f32.mrb[3].mxu1 }
 0x1b6   :  { %v1580_v12 = vmax.f32 %v2239_v4, 0.0  ;;  %v1582_v13 = vmax.f32 %v2241_v5, 0.0 }
 0x1b7   :  { %v1583_v14 = vmul.f32 8.0, %v1579_v8  ;;  %v1585_v15 = vmul.f32 8.0, %v1581_v9 }
 0x1b8   :  { %v1584_v16 = vmul.f32 8.0, %v1580_v12  ;;  %v1586_v17 = vmul.f32 8.0, %v1582_v13 }
 0x1b9   :  { %v2266_v18 = vround.rtne.f32 %v1583_v14  ;;  %v2268_v19 = vround.rtne.f32 %v1585_v15 }
 0x1ba   :  { %v2267_v20 = vround.rtne.f32 %v1584_v16  ;;  %v2269_v21 = vround.rtne.f32 %v1586_v17 }
 0x1bb   :  { %v1591_v22 = vmax.f32 %v2266_v18, -128.0  ;;  %v1593_v23 = vmax.f32 %v2268_v19, -128.0 }
 0x1bc   :  { %v1592_v24 = vmax.f32 %v2267_v20, -128.0  ;;  %v1594_v25 = vmax.f32 %v2269_v21, -128.0 }
 0x1bd   :  { %v1595_v26 = vmin.f32 %v1591_v22, 127.0  ;;  %v1597_v27 = vmin.f32 %v1593_v23, 127.0 }
 0x1be   :  { %v1596_v28 = vmin.f32 %v1592_v24, 127.0  ;;  %v1598_v29 = vmin.f32 %v1594_v25, 127.0 }
 0x1bf   :  { %v1599_v32 = vpack.c.bf16 %v1595_v26, %v1595_v26  ;;  %v1601_v33 = vpack.c.bf16 %v1597_v27, %v1597_v27 }
 0x1c0   :  { %v1600_v30 = vpack.c.bf16 %v1596_v28, %v1596_v28  ;;  %v1602_v31 = vpack.c.bf16 %v1598_v29, %v1598_v29 }
 0x1c2   :  { %1898 = vmatprep.mubr.bf16.mxu0 %v1600_v30  ;;  %1938 = vmatprep.mubr.bf16.mxu1 %v1602_v31 }
 0x1c3   :  { %1899 = vmatmul.mubr.bf16.vlgmr.msra.gmra.mrb[4].mxu0 %v1599_v32  ;;  %1939 = vmatmul.mubr.bf16.vlgmr.msra.gmra.mrb[4].mxu1 %v1601_v33 }
 0x296   :  { %v2210_v34 = vpop.f32.mrb[4].mxu0  ;;  %v2232_v35 = vpop.f32.mrb[4].mxu1 }
 0x297   :  { %v2211_v37 = vpop.f32.mrb[5].mxu0  ;;  %v2233_v38 = vpop.f32.mrb[5].mxu1 }
 0x298   :  { %v2212_v39 = vadd.f32 %v2211_v37, %v2210_v34  ;;  %v2234_v40 = vadd.f32 %v2233_v38, %v2232_v35  ;;  %v2213_v41 = vpop.f32.mrb[6].mxu0  ;;  %v2235_v42 = vpop.f32.mrb[6].mxu1 }
 0x299   :  { %v2214_v43 = vpop.f32.mrb[7].mxu0  ;;  %v2236_v44 = vpop.f32.mrb[7].mxu1 }
 0x29a   :  { %v1901_v45 = vadd.f32 %v2212_v39, %v2161_v36 }
 0x29c   :  { %v1941_v46 = vadd.f32 %v2234_v40, %v1901_v45 }
 0x29e   :  { %1946 = vmax.xlane.f32.xlu0 %v1941_v46 }
 0x32b   :  { %v1947_v47 = vpop.xlane.xlu0 %1946 }
 0x32c   :  { %v1948_v48 = vsub.f32 %v1941_v46, %v1947_v47 }
 0x32e   :  { %v1949_v49 = vmul.f32 1.442695, %v1948_v48 }
 0x330   :  { %2600 = vpow2.f32 %v1949_v49 }
 0x33a   :  { %v2601_v50 = vpop.eup %2600 }
 0x33b   :  { %1951 = vadd.xlane.f32.xlu0 %v2601_v50 }
 0x3c8   :  { %v1952_v51 = vpop.xlane.xlu0 %1951 }
 0x3c9   :  { %2602 = vlog2.f32 %v1952_v51 }
 0x3d3   :  { %v2603_v52 = vpop.eup %2602 }
 0x3d4   :  { %v1954_v53 = vmul.f32 0.6931472, %v2603_v52 }
 0x3d6   :  { %v1955_v54 = vsub.f32 %v1948_v48, %v1954_v53 }
 0x3d8   :  { %v1956_v55 = vpack.c.bf16 %v1955_v54, %v1955_v54 }
 0x3da   :  { %1957 = vst [vmem:[%s2805_s5] sm:$0xf] %v1956_v55 }
 0x3db   :  { %1962 = vsyncpa [#allocation3], 1 }

</bundles_post_ra>
